<compile_context>
chip_gen: v7x
topology: tpu7x:2x2x1
jax: 0.10.0
libtpu: 0.0.40
codegen_flags: <defaults>
</compile_context>

<pallas_src>
import jax
import jax.numpy as jnp
from jax import lax
from jax.experimental import pallas as pl
from jax.experimental.pallas import tpu as pltpu


def _round_up(x: int, m: int) -> int:
    return (x + m - 1) // m * m


def cosine_sim_kernel(x1_ref, x2t_ref, o_ref):
    # x1_ref : (tm, D)  tile of x1
    # x2t_ref: (D, tn)  tile of x2.T (pre-transposed in the wrapper)
    # o_ref  : (tm, tn) output tile
    a = x1_ref[...]            # keep native dtype -> fast MXU path for bf16
    bt = x2t_ref[...]

    # MXU matmul with f32 accumulation.
    dots = jnp.dot(a, bt, preferred_element_type=jnp.float32)       # (tm, tn)

    # Reciprocal row / column norms: squared sums on VPU/XLU, rsqrt on the EUP.
    af = a.astype(jnp.float32)
    btf = bt.astype(jnp.float32)
    inv_n1 = lax.rsqrt(jnp.sum(af * af, axis=1, keepdims=True))     # (tm, 1)
    inv_n2 = lax.rsqrt(jnp.sum(btf * btf, axis=0, keepdims=True))   # (1, tn)

    o_ref[...] = (dots * (inv_n1 * inv_n2)).astype(o_ref.dtype)


def cosine_similarity(x1, x2, *, tm=256, tn=512):
    """dist[i, j] = <x1[i], x2[j]> / (||x1[i]|| * ||x2[j]||)."""
    M, D = x1.shape
    N, D2 = x2.shape
    assert D == D2, "feature dims must match"

    # MXU-aligned effective tiles, clamped for small inputs.
    tm_e = min(tm, _round_up(M, 8))
    tn_e = min(tn, _round_up(N, 128))
    Mp = _round_up(M, tm_e)
    Np = _round_up(N, tn_e)

    # Pre-transpose x2 once (XLA-side) so the kernel never transposes.
    x2t = x2.T                                    # (D, N)
    if Mp != M:
        x1 = jnp.pad(x1, ((0, Mp - M), (0, 0)))
    if Np != N:
        x2t = jnp.pad(x2t, ((0, 0), (0, Np - N)))

    in_bytes = jnp.dtype(x1.dtype).itemsize
    # Double-buffered x1 tile, x2t tile, and f32 output tile.
    vmem_need = 2 * (tm_e * D * in_bytes + D * tn_e * in_bytes + tm_e * tn_e * 4)
    vmem_limit = int(min(max(vmem_need + (8 << 20), 32 << 20), 60 << 20))

    cost = pl.CostEstimate(
        flops=2 * M * N * D,
        transcendentals=M + N,
        bytes_accessed=in_bytes * (M * D + N * D) + 4 * M * N,
    )

    out = pl.pallas_call(
        cosine_sim_kernel,
        out_shape=jax.ShapeDtypeStruct((Mp, Np), jnp.float32),
        grid_spec=pltpu.PrefetchScalarGridSpec(
            num_scalar_prefetch=0,
            grid=(Mp // tm_e, Np // tn_e),
            in_specs=[
                pl.BlockSpec((tm_e, D), lambda i, j: (i, 0)),    # x1 row tile
                pl.BlockSpec((D, tn_e), lambda i, j: (0, j)),    # x2.T col tile
            ],
            out_specs=pl.BlockSpec((tm_e, tn_e), lambda i, j: (i, j)),
        ),
        compiler_params=pltpu.CompilerParams(
            dimension_semantics=("parallel", "parallel"),
            vmem_limit_bytes=vmem_limit,
        ),
        cost_estimate=cost,
    )(x1, x2t)

    return out[:M, :N]


if __name__ == "__main__":
    key = jax.random.PRNGKey(0)
    k1, k2 = jax.random.split(key)

    # Small 2-D matrices, as the module's forward expects.
    M, N, D = 16, 8, 128
    x1 = jax.random.normal(k1, (M, D), dtype=jnp.float32)
    x2 = jax.random.normal(k2, (N, D), dtype=jnp.float32)

    dist = cosine_similarity(x1, x2)
    dist = jax.block_until_ready(dist)

    # Pure-JAX reference (same math as the PyTorch module).
    n1 = jnp.linalg.norm(x1, axis=1, keepdims=True)          # (M, 1)
    n2 = jnp.linalg.norm(x2, axis=1, keepdims=True)          # (N, 1)
    ref = (x1 @ x2.T) * (1.0 / (n1 @ n2.T))

    assert dist.shape == (M, N)
    assert jnp.allclose(dist, ref, atol=1e-5, rtol=1e-5), float(
        jnp.max(jnp.abs(dist - ref))
    )

    print("KERNEL_OK")
</pallas_src>

<mosaic_0001>
module attributes {stable_mosaic.version = 11 : i64} {
  func.func @cosine_sim_kernel(%arg0: i32, %arg1: i32, %arg2: memref<16x128xf32, #tpu.memory_space<vmem>>, %arg3: memref<128x128xf32, #tpu.memory_space<vmem>>, %arg4: memref<16x128xf32, #tpu.memory_space<vmem>>) attributes {dimension_semantics = [#tpu.dimension_semantics<parallel>, #tpu.dimension_semantics<parallel>], iteration_bounds = array<i64: 1, 1>, scalar_prefetch = 0 : i64, scratch_operands = 0 : i64, tpu.core_type = #tpu.core_type<tc>, window_params = [{transform_indices = @transform_0, window_bounds = array<i64: 16, 128>}, {transform_indices = @transform_1, window_bounds = array<i64: 128, 128>}, {transform_indices = @transform_2, window_bounds = array<i64: 16, 128>}]} {
    %c0 = arith.constant 0 : index
    %c0_0 = arith.constant 0 : index
    %0 = vector.load %arg2[%c0, %c0_0] : memref<16x128xf32, #tpu.memory_space<vmem>>, vector<16x128xf32>
    %c0_1 = arith.constant 0 : index
    %c0_2 = arith.constant 0 : index
    %1 = vector.load %arg3[%c0_1, %c0_2] : memref<128x128xf32, #tpu.memory_space<vmem>>, vector<128x128xf32>
    %cst = arith.constant dense<0.000000e+00> : vector<16x128xf32>
    %2 = tpu.matmul %0, %1, %cst {dimension_numbers = #tpu.dot_dimension_numbers<[1], [0], [0], [1], [0, 0, 1, 1], [], []>} : vector<16x128xf32>, vector<128x128xf32>, vector<16x128xf32> -> vector<16x128xf32>
    %3 = arith.mulf %0, %0 : vector<16x128xf32>
    %cst_3 = arith.constant dense<0.000000e+00> : vector<16xf32>
    %4 = vector.multi_reduction <add>, %3, %cst_3 [1] : vector<16x128xf32> to vector<16xf32>
    %5 = vector.shape_cast %4 : vector<16xf32> to vector<16x1xf32>
    %6 = math.rsqrt %5 : vector<16x1xf32>
    %7 = arith.mulf %1, %1 : vector<128x128xf32>
    %cst_4 = arith.constant dense<0.000000e+00> : vector<128xf32>
    %8 = vector.multi_reduction <add>, %7, %cst_4 [0] : vector<128x128xf32> to vector<128xf32>
    %9 = vector.shape_cast %8 : vector<128xf32> to vector<1x128xf32>
    %10 = math.rsqrt %9 : vector<1x128xf32>
    %11 = vector.broadcast %6 : vector<16x1xf32> to vector<16x128xf32>
    %12 = vector.broadcast %10 : vector<1x128xf32> to vector<16x128xf32>
    %13 = arith.mulf %11, %12 : vector<16x128xf32>
    %14 = arith.mulf %2, %13 : vector<16x128xf32>
    %c0_5 = arith.constant 0 : index
    %c0_6 = arith.constant 0 : index
    %15 = vector.load %arg4[%c0_5, %c0_6] : memref<16x128xf32, #tpu.memory_space<vmem>>, vector<16x128xf32>
    tpu.vector_store %arg4[%c0_5, %c0_6], %14 {strides = array<i32>} : memref<16x128xf32, #tpu.memory_space<vmem>>, vector<16x128xf32>,
    return
  }
  func.func @transform_0(%arg0: i32, %arg1: i32) -> (i32, i32) {
    %c0_i32 = arith.constant 0 : i32
    %c0_i32_0 = arith.constant 0 : i32
    return %arg0, %c0_i32 : i32, i32
  }
  func.func @transform_1(%arg0: i32, %arg1: i32) -> (i32, i32) {
    %c0_i32 = arith.constant 0 : i32
    %c0_i32_0 = arith.constant 0 : i32
    return %c0_i32, %arg1 : i32, i32
  }
  func.func @transform_2(%arg0: i32, %arg1: i32) -> (i32, i32) {
    %c0_i32 = arith.constant 0 : i32
    return %arg0, %arg1 : i32, i32
  }
}

</mosaic_0001>

<bundles_post_ra>
// kernel: tpu_custom_call.1
= control target key start
LH: loop header
LB: loop body
LE: loop exit
PB: predicated region body
PF: predicated region fallthrough
CT: control target
= control target key end

     0   :  { %7 = vsyncpa [#allocation3], 0  ;;  %s436_s0 = inlined_call_operand.hbm [shape: f32[16,128], index: 0, kind: input, shape index: {}]   ;;  %s437_s1 = inlined_call_operand.hbm [shape: f32[128,128], index: 1, kind: input, shape index: {}]   ;;  %s438_s2 = inlined_call_operand.hbm [shape: f32[16,128], index: 2, kind: output, shape index: {}]  }
   0x1   :  { %8 = vsyncpa [#allocation6], 0 }
   0x2   :  { %9 = vsyncpa [#allocation4], 0  ;;  %s371_s9 = smov [#allocation2]   ;;  %s299_s13 = scalar_lea.hbm %s436_s0, 256 }
   0x3   :  { %s15_s10 = sshll.u32 %s371_s9, 4  ;;  %p300_p0 = scmp.ne.s32.totalorder %s436_s0, %s299_s13  ;;  %s16_s10 = int_to_ptr.vmem [resolvable:$true] %s15_s10 }
   0x4   :  { %p303_p1 = scmp.lt.u32.totalorder %s299_s13, %s436_s0 }
   0x6   :  { %p305_p2 = pnand %p303_p1, %p300_p0 }
   0x8   :  { %308 = shalt.err (!%p305_p2)
}
   0x9   :  { %s309_s18 = scalar_lea.vmem %s16_s10, 256  ;;  %p314_p4 = scmp.lt.s32.totalorder %s16_s10, %s16_s10 }
   0xa   :  { %p310_p3 = scmp.ne.s32.totalorder %s16_s10, %s309_s18  ;;  %p315_p5 = scmp.lt.s32.totalorder %s309_s18, %s309_s18 }
   0xc   :  { %p316_p6 = por %p315_p5, %p314_p4 }
   0xe   :  { %p317_p7 = pnand %p316_p6, %p310_p3 }
  0x10   :  { %320 = shalt.err (!%p317_p7)
}
  0x11   :  { %s372_s19 = smov 128   ;;  %s373_s20 = smov 8  }
  0x12   :  { %21 = dma.hbm_to_vmem [thread:$0]  %s436_s0, 256, %s16_s10, [#allocation3], %s372_s19, %s372_s19, %s373_s20  }
  0x13   :  { %s374_s23 = smov [#allocation5]   ;;  %s321_s27 = scalar_lea.hbm %s437_s1, 2048 }
  0x14   :  { %s27_s24 = sshll.u32 %s374_s23, 4  ;;  %p322_p8 = scmp.ne.s32.totalorder %s437_s1, %s321_s27  ;;  %s28_s24 = int_to_ptr.vmem [resolvable:$true] %s27_s24 }
  0x15   :  { %p325_p9 = scmp.lt.u32.totalorder %s321_s27, %s437_s1 }
  0x17   :  { %p327_p10 = pnand %p325_p9, %p322_p8 }
  0x19   :  { %330 = shalt.err (!%p327_p10)
}
  0x1a   :  { %s331_s4 = scalar_lea.vmem %s28_s24, 2048  ;;  %p336_p12 = scmp.lt.s32.totalorder %s28_s24, %s28_s24 }
  0x1b   :  { %p332_p11 = scmp.ne.s32.totalorder %s28_s24, %s331_s4  ;;  %p337_p13 = scmp.lt.s32.totalorder %s331_s4, %s331_s4 }
  0x1d   :  { %p338_p0 = por %p337_p13, %p336_p12 }
  0x1f   :  { %p339_p1 = pnand %p338_p0, %p332_p11 }
  0x21   :  { %342 = shalt.err (!%p339_p1)
}
  0x22   :  { %33 = dma.hbm_to_vmem [thread:$0]  %s437_s1, 2048, %s28_s24, [#allocation6], %s372_s19, %s372_s19, %s373_s20  }
  0x23   :  { %365 = dma.done.wait [#allocation3], 256  }
  0x24   :  { %366 = vsyncadd [#allocation3], 4294967040 }
  0x25   :  { %367 = dma.done.wait [#allocation6], 2048  }
  0x26   :  { %368 = vsyncadd [#allocation6], 4294965248  ;;  %v42_v0 = vld [vmem:[#allocation5] sm:$0xff]  ;;  %v43_v1 = vld [vmem:[#allocation5 + $0x8] sm:$0xff]  ;;  %s375_s1 = smov [#allocation7]  }
  0x27   :  { %v44_v2 = vld [vmem:[#allocation5 + $0x10] sm:$0xff]  ;;  %v256_v3 = vpack.c.bf16 %v43_v1, %v42_v0  ;;  %v141_v4 = vmul.f32 %v42_v0, %v42_v0  ;;  %v142_v5 = vmul.f32 %v43_v1, %v43_v1  ;;  %v45_v6 = vld [vmem:[#allocation5 + $0x18] sm:$0xff]  ;;  %v46_v9 = vld [vmem:[#allocation5 + $0x20] sm:$0xff]  ;;  %s190_s6 = sshll.u32 %s375_s1, 4  ;;  %s191_s6 = int_to_ptr.vmem [resolvable:$true] %s190_s6 }
  0x28   :  { %v143_v7 = vmul.f32 %v44_v2, %v44_v2  ;;  %v260_v8 = vpack.c.bf16 %v45_v6, %v44_v2  ;;  %v47_v10 = vld [vmem:[#allocation5 + $0x28] sm:$0xff]  ;;  %v144_v12 = vmul.f32 %v45_v6, %v45_v6  ;;  %v145_v15 = vmul.f32 %v46_v9, %v46_v9  ;;  %v48_v16 = vld [vmem:[#allocation5 + $0x30] sm:$0xff]  ;;  %v49_v17 = vld [vmem:[#allocation5 + $0x38] sm:$0xff]  ;;  %s343_s7 = scalar_lea.vmem %s191_s6, 256  ;;  %p348_p3 = scmp.lt.s32.totalorder %s191_s6, %s191_s6 }
  0x29   :  { %257 = vmatprep.subr.bf16.mxu0 %v256_v3  ;;  %v157_v11 = vadd.f32 %v142_v5, %v141_v4  ;;  %v264_v14 = vpack.c.bf16 %v47_v10, %v46_v9  ;;  %v40_v18 = vld [vmem:[#allocation2] sm:$0xff]  ;;  %v146_v20 = vmul.f32 %v47_v10, %v47_v10  ;;  %v268_v22 = vpack.c.bf16 %v49_v17, %v48_v16  ;;  %v41_v23 = vld [vmem:[#allocation2 + $0x8] sm:$0xff]  ;;  %v50_v27 = vld [vmem:[#allocation5 + $0x40] sm:$0xff]  ;;  %p344_p2 = scmp.ne.s32.totalorder %s191_s6, %s343_s7  ;;  %p349_p4 = scmp.lt.s32.totalorder %s343_s7, %s343_s7 }
  0x2a   :  { %259 = vmatpush3.bf16.msra.mxu0 %v256_v3  ;;  %253 = vmatprep.mubr.f32.mxu0 %v40_v18  ;;  %v133_v21 = vmul.f32 %v40_v18, %v40_v18  ;;  %v147_v25 = vmul.f32 %v48_v16, %v48_v16  ;;  %v134_v26 = vmul.f32 %v41_v23, %v41_v23  ;;  %v51_v28 = vld [vmem:[#allocation5 + $0x48] sm:$0xff]  ;;  %v52_v34 = vld [vmem:[#allocation5 + $0x50] sm:$0xff]  ;;  %v53_v35 = vld [vmem:[#allocation5 + $0x58] sm:$0xff] }
  0x2b   :  { %261 = vmatprep.subr.bf16.mxu0 %v260_v8  ;;  %v158_v13 = vadd.f32 %v157_v11, %v143_v7  ;;  %v148_v30 = vmul.f32 %v49_v17, %v49_v17  ;;  %v272_v32 = vpack.c.bf16 %v51_v28, %v50_v27  ;;  %v149_v33 = vmul.f32 %v50_v27, %v50_v27  ;;  %v54_v41 = vld [vmem:[#allocation5 + $0x60] sm:$0xff]  ;;  %v55_v42 = vld [vmem:[#allocation5 + $0x68] sm:$0xff]  ;;  %v56_v48 = vld [vmem:[#allocation5 + $0x70] sm:$0xff]  ;;  %p350_p5 = por %p349_p4, %p348_p3 }
  0x2c   :  { %135 = vadd.xlane.f32.xlu0 %v133_v21  ;;  %v150_v37 = vmul.f32 %v51_v28, %v51_v28  ;;  %v276_v39 = vpack.c.bf16 %v53_v35, %v52_v34  ;;  %v151_v40 = vmul.f32 %v52_v34, %v52_v34  ;;  %v152_v44 = vmul.f32 %v53_v35, %v53_v35  ;;  %v57_v49 = vld [vmem:[#allocation5 + $0x78] sm:$0xff] }
  0x2d   :  { %v159_v19 = vadd.f32 %v158_v13, %v144_v12  ;;  %v280_v46 = vpack.c.bf16 %v55_v42, %v54_v41  ;;  %v153_v47 = vmul.f32 %v54_v41, %v54_v41  ;;  %v154_v51 = vmul.f32 %v55_v42, %v55_v42  ;;  %p351_p6 = pnand %p350_p5, %p344_p2 }
  0x2e   :  { %263 = vmatpush3.bf16.msra.mxu0 %v260_v8  ;;  %v284_v53 = vpack.c.bf16 %v57_v49, %v56_v48  ;;  %v155_v54 = vmul.f32 %v56_v48, %v56_v48  ;;  %v156_v56 = vmul.f32 %v57_v49, %v57_v49 }
  0x2f   :  { %265 = vmatprep.subr.bf16.mxu0 %v264_v14  ;;  %v160_v24 = vadd.f32 %v159_v19, %v145_v15 }
  0x30   :  { %137 = vadd.xlane.f32.xlu0 %v134_v26 }
  0x31   :  { %v161_v29 = vadd.f32 %v160_v24, %v146_v20 }
  0x32   :  { %267 = vmatpush3.bf16.msra.mxu0 %v264_v14 }
  0x33   :  { %269 = vmatprep.subr.bf16.mxu0 %v268_v22  ;;  %v162_v31 = vadd.f32 %v161_v29, %v147_v25 }
  0x35   :  { %v163_v36 = vadd.f32 %v162_v31, %v148_v30 }
  0x36   :  { %271 = vmatpush3.bf16.msra.mxu0 %v268_v22 }
  0x37   :  { %273 = vmatprep.subr.bf16.mxu0 %v272_v32  ;;  %v164_v38 = vadd.f32 %v163_v36, %v149_v33 }
  0x39   :  { %v165_v43 = vadd.f32 %v164_v38, %v150_v37 }
  0x3a   :  { %275 = vmatpush3.bf16.msra.mxu0 %v272_v32 }
  0x3b   :  { %277 = vmatprep.subr.bf16.mxu0 %v276_v39  ;;  %v166_v45 = vadd.f32 %v165_v43, %v151_v40 }
  0x3d   :  { %v167_v50 = vadd.f32 %v166_v45, %v152_v44 }
  0x3e   :  { %279 = vmatpush3.bf16.msra.mxu0 %v276_v39 }
  0x3f   :  { %281 = vmatprep.subr.bf16.mxu0 %v280_v46  ;;  %v168_v52 = vadd.f32 %v167_v50, %v153_v47 }
  0x41   :  { %v169_v55 = vadd.f32 %v168_v52, %v154_v51 }
  0x42   :  { %283 = vmatpush3.bf16.msra.mxu0 %v280_v46 }
  0x43   :  { %285 = vmatprep.subr.bf16.mxu0 %v284_v53  ;;  %v170_v57 = vadd.f32 %v169_v55, %v155_v54 }
  0x45   :  { %v171_v58 = vadd.f32 %v170_v57, %v156_v56 }
  0x46   :  { %287 = vmatpush3.bf16.msra.mxu0 %v284_v53 }
  0x47   :  { %v172_v59 = vrot.slane %v171_v58, 4 }
  0x49   :  { %254 = vmatmul.mubr.f32.vlgmr.msra.gmra.mrb[0].mxu0 %v41_v23  ;;  %v173_v60 = vadd.f32 %v172_v59, %v171_v58 }
  0x4b   :  { %v174_v61 = vrot.slane %v173_v60, 2 }
  0x4d   :  { %v175_v62 = vadd.f32 %v174_v61, %v173_v60 }
  0x4f   :  { %v176_v0 = vrot.slane %v175_v62, 1 }
  0x51   :  { %v177_v2 = vadd.f32 %v176_v0, %v175_v62 }
  0xb9   :  { %v136_v63 = vpop.xlane.xlu0 %135 }
  0xbd   :  { %v138_v1 = vpop.xlane.xlu0 %137 }
  0xbe   :  { %293 = vrsqrt.f32 %v138_v1 }
  0xbf   :  { %295 = vrsqrt.f32 %v177_v2 }
  0xc0   :  { %297 = vrsqrt.f32 %v136_v63 }
  0xc8   :  { %v294_v3 = vpop.eup %293 }
  0xc9   :  { %v296_v4 = vpop.eup %295 }
  0xca   :  { %v298_v5 = vpop.eup %297  ;;  %v180_v6 = vmul.f32 %v296_v4, %v294_v3 }
  0xcb   :  { %v179_v8 = vmul.f32 %v298_v5, %v296_v4 }
 0x11c   :  { %v255_v7 = vpop.f32.mrb[0].mxu0 }
 0x11d   :  { %v182_v9 = vmul.f32 %v255_v7, %v180_v6  ;;  %v124_v10 = vpop.f32.mrb[1].mxu0 }
 0x11e   :  { %v181_v11 = vmul.f32 %v179_v8, %v124_v10 }
 0x11f   :  { %184 = vst [vmem:[#allocation7 + $0x8] sm:$0xff] %v182_v9 }
 0x120   :  { %183 = vst [vmem:[#allocation7] sm:$0xff] %v181_v11 }
 0x121   :  { %354 = shalt.err (!%p351_p6)
}
 0x122   :  { %s355_s10 = scalar_lea.hbm %s438_s2, 256 }
 0x123   :  { %p356_p7 = scmp.ne.s32.totalorder %s438_s2, %s355_s10  ;;  %p359_p8 = scmp.lt.u32.totalorder %s355_s10, %s438_s2 }
 0x125   :  { %p361_p9 = pnand %p359_p8, %p356_p7 }
 0x127   :  { %364 = shalt.err (!%p361_p9)
}
 0x128   :  { %196 = dma.vmem_to_hbm [thread:$0]  %s191_s6, 256, %s438_s2, [#allocation4], %s372_s19, %s372_s19, %s373_s20  }
 0x129   :  { %369 = dma.done.wait [#allocation4], 256  }
 0x12a   :  { %370 = vsyncadd [#allocation4], 4294967040 }
 0x12b   :  { %200 = vsyncpa [#allocation3], 1 }
 0x12c   :  { %201 = vsyncpa [#allocation6], 1 }
 0x12d   :  { %202 = vsyncpa [#allocation4], 1 }

</bundles_post_ra>
